<compile_context>
chip_gen: v6e
topology: v6e:2x2x1
jax: 0.10.0
libtpu: 0.0.40
codegen_flags: <defaults>
</compile_context>

<pallas_src>
import jax
import jax.numpy as jnp
from jax.experimental import pallas as pl
from jax.experimental.pallas import tpu as pltpu


def attention_kernel(x_ref, w1_ref, b1_ref, w2_ref, b2_ref, att_ref, wts_ref):
    tb, s, d = x_ref.shape
    x = x_ref[...]                                            # (TB, S, 2H) fp32

    # One GEMM for all TB*S rows: (TB*S, 2H) @ (2H, H) -> (TB*S, H), +b1, tanh.
    # Merging leading dims does not touch the lane dim, so the reshape is free.
    h = jnp.tanh(
        jnp.dot(x.reshape(tb * s, d), w1_ref[...],
                preferred_element_type=jnp.float32)
        + b1_ref[...]
    )                                                         # (TB*S, H)

    # Linear(H -> 1): VPU multiply against the (1, H) W2 row + lane reduction.
    h3 = h.reshape(tb, s, h.shape[-1])                        # (TB, S, H)
    scores = jnp.sum(h3 * w2_ref[...], axis=-1) + b2_ref[0]   # (TB, S) lane-dense

    # softmax over the sequence axis (dim=1 in the PyTorch module).
    m = jnp.max(scores, axis=-1, keepdims=True)               # (TB, 1)
    e = jnp.exp(scores - m)                                    # (TB, S)
    denom = jnp.sum(e, axis=-1, keepdims=True)                 # (TB, 1)
    w = e * pl.reciprocal(denom, approx=True)                  # (TB, S)

    wts_ref[...] = w.astype(wts_ref.dtype)

    # attended[b, :] = sum_s w[b, s] * x[b, s, :]  -> (TB, 2H)
    att_ref[...] = jnp.sum(w[:, :, None] * x, axis=1).astype(att_ref.dtype)


def _pick_tb(B, S, max_rows=1024):
    """Batch-block size: fuse as many batch rows as possible into one GEMM while
    keeping the (TB*S, 2H) activation block modest (VMEM headroom incl. v7x).
    Returned TB either equals B (single grid step, full extent — always a legal
    block) or is a divisor of B that is a multiple of 8 (sublane-aligned)."""
    if B * S <= max_rows:
        return B
    for cand in range(B - 1, 0, -1):
        if B % cand == 0 and cand * S <= max_rows and cand % 8 == 0:
            return cand
    return B  # fall back to whole batch in one step


def attention_layer(hidden_states, w1, b1, w2, b2):
    """hidden_states: (B, S, 2H); returns (attended (B, 2H), weights (B, S, 1))."""
    B, S, D = hidden_states.shape
    H = w1.shape[1]
    TB = _pick_tb(B, S)

    b1_2d = b1.reshape(1, H)
    w2_row = w2.reshape(1, H)      # (H, 1) column -> (1, H) lane-dense row
    b2_1d = b2.reshape(1)

    out_shapes = (
        jax.ShapeDtypeStruct((B, D), hidden_states.dtype),   # attended
        jax.ShapeDtypeStruct((B, S), hidden_states.dtype),   # weights (lane-dense)
    )
    grid_spec = pltpu.PrefetchScalarGridSpec(
        num_scalar_prefetch=0,
        grid=(B // TB,),
        in_specs=[
            pl.BlockSpec((TB, S, D), lambda b: (b, 0, 0)),      # hidden_states block
            pl.BlockSpec((D, H), lambda b: (0, 0)),             # W1 (resident)
            pl.BlockSpec((1, H), lambda b: (0, 0)),             # b1 row (resident)
            pl.BlockSpec((1, H), lambda b: (0, 0)),             # W2 row (resident)
            pl.BlockSpec(memory_space=pltpu.MemorySpace.SMEM),  # b2 scalar in SMEM
        ],
        out_specs=[
            pl.BlockSpec((TB, D), lambda b: (b, 0)),            # attended
            pl.BlockSpec((TB, S), lambda b: (b, 0)),            # attention weights
        ],
    )
    attended, weights = pl.pallas_call(
        attention_kernel,
        out_shape=out_shapes,
        grid_spec=grid_spec,
        compiler_params=pltpu.CompilerParams(
            dimension_semantics=("parallel",)
        ),
    )(hidden_states, w1, b1_2d, w2_row, b2_1d)
    # Match the PyTorch module's (B, S, 1) weights shape.
    return attended, weights.reshape(B, S, 1)


def attention_layer_ref(hidden_states, w1, b1, w2, b2):
    h = jnp.tanh(hidden_states @ w1 + b1)
    scores = h @ w2 + b2                                  # (B, S, 1)
    w = jax.nn.softmax(scores, axis=1)
    attended = jnp.sum(w * hidden_states, axis=1)
    return attended, w


if __name__ == "__main__":
    hidden_size = 32          # PyTorch module's hidden_size
    B, S = 2, 8
    D = hidden_size * 2       # input feature dim = hidden_size * 2

    key = jax.random.PRNGKey(0)
    kx, k1, k2, k3, k4 = jax.random.split(key, 5)
    hidden_states = jax.random.normal(kx, (B, S, D), dtype=jnp.float32)
    # Deterministic parameter init (Linear(2H->H), Linear(H->1))
    w1 = jax.random.normal(k1, (D, hidden_size), dtype=jnp.float32) * 0.1
    b1 = jax.random.normal(k2, (hidden_size,), dtype=jnp.float32) * 0.1
    w2 = jax.random.normal(k3, (hidden_size, 1), dtype=jnp.float32) * 0.1
    b2 = jax.random.normal(k4, (1,), dtype=jnp.float32) * 0.1

    attended, weights = attention_layer(hidden_states, w1, b1, w2, b2)
    jax.block_until_ready((attended, weights))

    att_ref, w_ref = attention_layer_ref(hidden_states, w1, b1, w2, b2)
    assert attended.shape == (B, D)
    assert weights.shape == (B, S, 1)
    # Tolerance accommodates the EUP approx reciprocal in the softmax normalize.
    assert jnp.allclose(attended, att_ref, atol=1e-3, rtol=1e-3)
    assert jnp.allclose(weights, w_ref, atol=1e-3, rtol=1e-3)
    print("KERNEL_OK")
</pallas_src>

<mosaic_0001>
module attributes {stable_mosaic.version = 11 : i64} {
  func.func @attention_kernel(%arg0: i32, %arg1: memref<2x8x64xf32, #tpu.memory_space<vmem>>, %arg2: memref<64x32xf32, #tpu.memory_space<vmem>>, %arg3: memref<1x32xf32, #tpu.memory_space<vmem>>, %arg4: memref<1x32xf32, #tpu.memory_space<vmem>>, %arg5: memref<1xf32, #tpu.memory_space<smem>>, %arg6: memref<2x64xf32, #tpu.memory_space<vmem>>, %arg7: memref<2x8xf32, #tpu.memory_space<vmem>>) attributes {dimension_semantics = [#tpu.dimension_semantics<parallel>], iteration_bounds = array<i64: 1>, scalar_prefetch = 0 : i64, scratch_operands = 0 : i64, tpu.core_type = #tpu.core_type<tc>, window_params = [{transform_indices = @transform_0, window_bounds = array<i64: 2, 8, 64>}, {pipeline_mode = #tpu.pipeline_mode<synchronous>, transform_indices = @transform_1, window_bounds = array<i64: 64, 32>}, {pipeline_mode = #tpu.pipeline_mode<synchronous>, transform_indices = @transform_2, window_bounds = array<i64: 1, 32>}, {pipeline_mode = #tpu.pipeline_mode<synchronous>, transform_indices = @transform_3, window_bounds = array<i64: 1, 32>}, {transform_indices = @transform_4, window_bounds = array<i64: 1>}, {transform_indices = @transform_5, window_bounds = array<i64: 2, 64>}, {transform_indices = @transform_6, window_bounds = array<i64: 2, 8>}]} {
    %c0 = arith.constant 0 : index
    %c0_0 = arith.constant 0 : index
    %c0_1 = arith.constant 0 : index
    %0 = vector.load %arg1[%c0, %c0_0, %c0_1] : memref<2x8x64xf32, #tpu.memory_space<vmem>>, vector<2x8x64xf32>
    %1 = vector.shape_cast %0 : vector<2x8x64xf32> to vector<16x64xf32>
    %c0_2 = arith.constant 0 : index
    %c0_3 = arith.constant 0 : index
    %2 = vector.load %arg2[%c0_2, %c0_3] : memref<64x32xf32, #tpu.memory_space<vmem>>, vector<64x32xf32>
    %cst = arith.constant dense<0.000000e+00> : vector<16x32xf32>
    %3 = tpu.matmul %1, %2, %cst {dimension_numbers = #tpu.dot_dimension_numbers<[1], [0], [0], [1], [0, 0, 1, 1], [], []>} : vector<16x64xf32>, vector<64x32xf32>, vector<16x32xf32> -> vector<16x32xf32>
    %c0_4 = arith.constant 0 : index
    %c0_5 = arith.constant 0 : index
    %4 = vector.load %arg3[%c0_4, %c0_5] : memref<1x32xf32, #tpu.memory_space<vmem>>, vector<1x32xf32>
    %5 = vector.broadcast %4 : vector<1x32xf32> to vector<16x32xf32>
    %6 = arith.addf %3, %5 : vector<16x32xf32>
    %7 = math.tanh %6 : vector<16x32xf32>
    %8 = vector.shape_cast %7 : vector<16x32xf32> to vector<2x8x32xf32>
    %c0_6 = arith.constant 0 : index
    %c0_7 = arith.constant 0 : index
    %9 = vector.load %arg4[%c0_6, %c0_7] : memref<1x32xf32, #tpu.memory_space<vmem>>, vector<1x32xf32>
    %10 = vector.shape_cast %9 : vector<1x32xf32> to vector<1x1x32xf32>
    %11 = vector.broadcast %10 : vector<1x1x32xf32> to vector<2x8x32xf32>
    %12 = arith.mulf %8, %11 : vector<2x8x32xf32>
    %cst_8 = arith.constant dense<0.000000e+00> : vector<2x8xf32>
    %13 = vector.multi_reduction <add>, %12, %cst_8 [2] : vector<2x8x32xf32> to vector<2x8xf32>
    %c0_9 = arith.constant 0 : index
    %14 = memref.load %arg5[%c0_9] : memref<1xf32, #tpu.memory_space<smem>>
    %15 = vector.broadcast %14 : f32 to vector<2x8xf32>
    %16 = arith.addf %13, %15 : vector<2x8xf32>
    %cst_10 = arith.constant dense<0xFF800000> : vector<2xf32>
    %17 = vector.multi_reduction <maximumf>, %16, %cst_10 [1] : vector<2x8xf32> to vector<2xf32>
    %18 = vector.shape_cast %17 : vector<2xf32> to vector<2x1xf32>
    %19 = vector.broadcast %18 : vector<2x1xf32> to vector<2x8xf32>
    %20 = arith.subf %16, %19 : vector<2x8xf32>
    %21 = math.exp %20 : vector<2x8xf32>
    %cst_11 = arith.constant dense<0.000000e+00> : vector<2xf32>
    %22 = vector.multi_reduction <add>, %21, %cst_11 [1] : vector<2x8xf32> to vector<2xf32>
    %23 = vector.shape_cast %22 : vector<2xf32> to vector<2x1xf32>
    %24 = tpu.reciprocal %23 {approx = true} : vector<2x1xf32> -> vector<2x1xf32>
    %25 = vector.broadcast %24 : vector<2x1xf32> to vector<2x8xf32>
    %26 = arith.mulf %21, %25 : vector<2x8xf32>
    %c0_12 = arith.constant 0 : index
    %c0_13 = arith.constant 0 : index
    %27 = vector.load %arg7[%c0_12, %c0_13] : memref<2x8xf32, #tpu.memory_space<vmem>>, vector<2x8xf32>
    tpu.vector_store %arg7[%c0_12, %c0_13], %26 {strides = array<i32>} : memref<2x8xf32, #tpu.memory_space<vmem>>, vector<2x8xf32>,
    %28 = vector.shape_cast %26 : vector<2x8xf32> to vector<2x8x1xf32>
    %29 = vector.broadcast %28 : vector<2x8x1xf32> to vector<2x8x64xf32>
    %30 = arith.mulf %29, %0 : vector<2x8x64xf32>
    %cst_14 = arith.constant dense<0.000000e+00> : vector<2x64xf32>
    %31 = vector.multi_reduction <add>, %30, %cst_14 [1] : vector<2x8x64xf32> to vector<2x64xf32>
    %c0_15 = arith.constant 0 : index
    %c0_16 = arith.constant 0 : index
    %32 = vector.load %arg6[%c0_15, %c0_16] : memref<2x64xf32, #tpu.memory_space<vmem>>, vector<2x64xf32>
    tpu.vector_store %arg6[%c0_15, %c0_16], %31 {strides = array<i32>} : memref<2x64xf32, #tpu.memory_space<vmem>>, vector<2x64xf32>,
    return
  }
  func.func @transform_0(%arg0: i32) -> (i32, i32, i32) {
    %c0_i32 = arith.constant 0 : i32
    %c0_i32_0 = arith.constant 0 : i32
    %c0_i32_1 = arith.constant 0 : i32
    return %arg0, %c0_i32, %c0_i32_0 : i32, i32, i32
  }
  func.func @transform_1(%arg0: i32) -> (i32, i32) {
    %c0_i32 = arith.constant 0 : i32
    %c0_i32_0 = arith.constant 0 : i32
    %c0_i32_1 = arith.constant 0 : i32
    return %c0_i32, %c0_i32_0 : i32, i32
  }
  func.func @transform_2(%arg0: i32) -> (i32, i32) {
    %c0_i32 = arith.constant 0 : i32
    %c0_i32_0 = arith.constant 0 : i32
    %c0_i32_1 = arith.constant 0 : i32
    return %c0_i32, %c0_i32_0 : i32, i32
  }
  func.func @transform_3(%arg0: i32) -> (i32, i32) {
    %c0_i32 = arith.constant 0 : i32
    %c0_i32_0 = arith.constant 0 : i32
    %c0_i32_1 = arith.constant 0 : i32
    return %c0_i32, %c0_i32_0 : i32, i32
  }
  func.func @transform_4(%arg0: i32) -> i32 {
    %c0_i32 = arith.constant 0 : i32
    %c0_i32_0 = arith.constant 0 : i32
    return %c0_i32 : i32
  }
  func.func @transform_5(%arg0: i32) -> (i32, i32) {
    %c0_i32 = arith.constant 0 : i32
    %c0_i32_0 = arith.constant 0 : i32
    return %arg0, %c0_i32 : i32, i32
  }
  func.func @transform_6(%arg0: i32) -> (i32, i32) {
    %c0_i32 = arith.constant 0 : i32
    %c0_i32_0 = arith.constant 0 : i32
    return %arg0, %c0_i32 : i32, i32
  }
}

</mosaic_0001>

<bundles_post_ra>
// kernel: tpu_custom_call.1
= control target key start
LH: loop header
LB: loop body
LE: loop exit
PB: predicated region body
PF: predicated region fallthrough
CT: control target
= control target key end

     0   :  { %13 = vsyncpa [#allocation4], 0  ;;  %vm42_vm0 = vcmask 523264   ;;  %s482_s0 = inlined_call_operand.vmem [shape: f32[2,8,64], index: 0, kind: input, shape index: {}]   ;;  %s483_s1 = inlined_call_operand.vmem [shape: f32[64,32], index: 1, kind: input, shape index: {}]   ;;  %s484_s2 = inlined_call_operand.vmem [shape: f32[1,32], index: 2, kind: input, shape index: {}]   ;;  %s485_s3 = inlined_call_operand.vmem [shape: f32[1,32], index: 3, kind: input, shape index: {}]   ;;  %s486_s4 = inlined_call_operand.<no memory space> [shape: f32[1], index: 4, kind: input, shape index: {}]   ;;  %s487_s5 = inlined_call_operand.hbm [shape: f32[2,64], index: 5, kind: output, shape index: {0}]   ;;  %s488_s6 = inlined_call_operand.hbm [shape: f32[2,8], index: 6, kind: output, shape index: {1}]  }
   0x1   :  { %v34_v0 = vld [vmem:[%s483_s1 + $0x38] sm:$0xff]  ;;  %v33_v1 = vld [vmem:[%s483_s1 + $0x30] sm:$0xff]  ;;  %v32_v2 = vld [vmem:[%s483_s1 + $0x28] sm:$0xff] }
   0x2   :  { %302 = vmatprep.subr.mxu0 %v34_v0  ;;  %v430_v3 = vld [vmem:[%s482_s0] sm:$0xff] }
   0x3   :  { %303 = vmatpush3.msra.mxu0 %v34_v0  ;;  %318 = vmatprep.mubr.msk.f32.mxu0 %vm42_vm0, %v430_v3 }
   0x4   :  { %304 = vmatprep.subr.mxu0 %v33_v1 }
   0x5   :  { %14 = vsyncpa [#allocation6], 0  ;;  %305 = vmatpush3.msra.mxu0 %v33_v1  ;;  %v31_v4 = vld [vmem:[%s483_s1 + $0x20] sm:$0xff]  ;;  %v30_v5 = vld [vmem:[%s483_s1 + $0x18] sm:$0xff]  ;;  %vm135_vm1 = vcmask 261120   ;;  %v148_v22 = vlaneseq  ;;  %v143_v25 = vstv %s486_s4  ;;  %vm158_vm2 = vcmask 1041409  }
   0x6   :  { %306 = vmatprep.subr.mxu0 %v32_v2  ;;  %v29_v6 = vld [vmem:[%s483_s1 + $0x10] sm:$0xff]  ;;  %v28_v7 = vld [vmem:[%s483_s1 + $0x8] sm:$0xff]  ;;  %v27_v8 = vld [vmem:[%s483_s1] sm:$0xff]  ;;  %vm161_vm3 = vcmask 58368   ;;  %v380_v35 = vmov 0  }
   0x7   :  { %307 = vmatpush3.msra.mxu0 %v32_v2  ;;  %v452_v9 = vld [vmem:[%s482_s0 + $0x8] sm:$0xff]  ;;  %v288_v10 = vld [vmem:[%s484_s2] ss:$0 sm:$0xff]  ;;  %v149_v23 = vand.u32 127, %v148_v22  ;;  %v151_v24 = vshrl.u32 %v148_v22, 7  ;;  %325 = vset.pattern.permute.xlu0 %v380_v35 }
   0x8   :  { %308 = vmatprep.subr.mxu0 %v31_v4  ;;  %v291_v17 = vld [vmem:[%s485_s3] ss:$0 sm:$0xff]  ;;  %324 = vset.pattern.permute.xlu1 %v380_v35  ;;  %s381_s3 = smov [#allocation5]  }
   0x9   :  { %309 = vmatpush3.msra.mxu0 %v31_v4  ;;  %v152_v27 = vsub.s32 %v149_v23, %v151_v24  ;;  %v168_v36 = vsub.s32 0, %v151_v24  ;;  %v172_v37 = vsub.s32 1, %v151_v24  ;;  %s276_s4 = sshll.u32 %s381_s3, 4  ;;  %s277_s4 = int_to_ptr.vmem [resolvable:$true] %s276_s4 }
   0xa   :  { %310 = vmatprep.subr.mxu0 %v30_v5  ;;  %s336_s20 = scalar_lea.vmem %s277_s4, 32  ;;  %p341_p1 = scmp.lt.s32.totalorder %s277_s4, %s277_s4 }
   0xb   :  { %311 = vmatpush3.msra.mxu0 %v30_v5  ;;  %p337_p0 = scmp.ne.s32.totalorder %s277_s4, %s336_s20  ;;  %p342_p2 = scmp.lt.s32.totalorder %s336_s20, %s336_s20 }
   0xc   :  { %312 = vmatprep.subr.mxu0 %v29_v6 }
   0xd   :  { %313 = vmatpush3.msra.mxu0 %v29_v6  ;;  %p343_p3 = por %p342_p2, %p341_p1 }
   0xe   :  { %314 = vmatprep.subr.mxu0 %v28_v7 }
   0xf   :  { %315 = vmatpush3.msra.mxu0 %v28_v7  ;;  %p344_p4 = pnand %p343_p3, %p337_p0 }
  0x10   :  { %316 = vmatprep.subr.mxu0 %v27_v8 }
  0x11   :  { %317 = vmatpush3.msra.mxu0 %v27_v8 }
  0x12   :  { %319 = vmatmul.mubr.msk.f32.vlgmr.msra.gmra.mxu0 %vm42_vm0, %v452_v9 }
  0xd2   :  { %v320_v11 = vpop.f32.mrf.mxu0 }
  0xd3   :  { %v121_v12 = vadd.f32 %v320_v11, %v288_v10 }
  0xd4   :  { %v115_v13 = vpop.f32.mrf.mxu0 }
  0xd5   :  { %v116_v14 = vadd.f32 %v288_v10, %v115_v13  ;;  %326 = vtanh.f32 %v121_v12 }
  0xd7   :  { %328 = vtanh.f32 %v116_v14 }
  0xe2   :  { %v327_v15 = vpop.eup %326 }
  0xe3   :  { %v134_v20 = vmul.f32 %v327_v15, %v291_v17 }
  0xe4   :  { %v329_v16 = vpop.eup %328 }
  0xe5   :  { %v133_v18 = vmul.f32 %v329_v16, %v291_v17  ;;  %v139_v21 = vsel %vm135_vm1, %v134_v20, 0.0 }
  0xe7   :  { %v136_v19 = vsel %vm135_vm1, %v133_v18, 0.0 }
  0xe8   :  { %137 = vadd.xlane.f32.xlu0 %v136_v19 }
  0xec   :  { %140 = vadd.xlane.f32.xlu0 %v139_v21 }
 0x171   :  { %v138_v26 = vpop.xlane.xlu0 %137 }
 0x172   :  { %v144_v28 = vadd.f32 %v143_v25, %v138_v26 }
 0x174   :  { %v153_v31 = vrot.slane %v144_v28, %v152_v27 }
 0x175   :  { %v141_v29 = vpop.xlane.xlu0 %140 }
 0x176   :  { %v145_v30 = vadd.f32 %v143_v25, %v141_v29 }
 0x178   :  { %v157_v32 = vrot.slane %v145_v30, %v152_v27 }
 0x17a   :  { %v159_v33 = vsel %vm158_vm2, %v157_v32, %v153_v31 }
 0x17b   :  { %v162_v34 = vsel %vm161_vm3, %v159_v33, -inf }
 0x17c   :  { %163 = vmax.xlane.f32.xlu1 %v162_v34 }
 0x205   :  { %v164_v38 = vpop.xlane.xlu1 %163 }
 0x206   :  { %v169_v39 = vrot.slane %v164_v38, %v168_v36  ;;  %v173_v40 = vrot.slane %v164_v38, %v172_v37 }
 0x208   :  { %v176_v41 = vsub.f32 %v144_v28, %v169_v39  ;;  %v177_v42 = vsub.f32 %v145_v30, %v173_v40 }
 0x20a   :  { %v178_v43 = vmul.f32 1.442695, %v176_v41  ;;  %v180_v44 = vmul.f32 1.442695, %v177_v42 }
 0x20c   :  { %330 = vpow2.f32 %v178_v43 }
 0x20d   :  { %332 = vpow2.f32 %v180_v44 }
 0x219   :  { %v331_v45 = vpop.eup %330 }
 0x21a   :  { %v333_v46 = vpop.eup %332  ;;  %185 = vperm.xlu1 %324, %v331_v45  }
 0x21b   :  { %188 = vperm.xlu0 %325, %v333_v46  }
 0x295   :  { %v186_v47 = vpop.permute.xlu1 %185 }
 0x296   :  { %v189_v48 = vpop.permute.xlu0 %188  ;;  %v193_v49 = vrot.slane %v186_v47, %v152_v27 }
 0x297   :  { %v197_v50 = vrot.slane %v189_v48, %v152_v27 }
 0x299   :  { %v198_v51 = vsel %vm158_vm2, %v197_v50, %v193_v49 }
 0x29a   :  { %v200_v52 = vsel %vm161_vm3, %v198_v51, 0.0 }
 0x29b   :  { %201 = vadd.xlane.f32.xlu1 %v200_v52 }
 0x324   :  { %v202_v53 = vpop.xlane.xlu1 %201 }
 0x325   :  { %334 = vrcp.f32 %v202_v53 }
 0x332   :  { %v335_v54 = vpop.eup %334 }
 0x333   :  { %v208_v55 = vrot.slane %v335_v54, %v168_v36  ;;  %v212_v57 = vrot.slane %v335_v54, %v172_v37 }
 0x335   :  { %v215_v56 = vmul.f32 %v331_v45, %v208_v55  ;;  %v216_v58 = vmul.f32 %v333_v46, %v212_v57 }
 0x337   :  { %220 = vperm.xlu0 %325, %v215_v56  }
 0x33b   :  { %223 = vperm.xlu0 %325, %v216_v58  }
 0x3b2   :  { %v221_v59 = vpop.permute.xlu0 %220 }
 0x3b3   :  { %v238_v60 = vmul.f32 %v221_v59, %v430_v3  ;;  %v228_v0 = vrot.slane %v221_v59, %v152_v27 }
 0x3b5   :  { %v240_v61 = vsel %vm42_vm0, %v238_v60, 0.0 }
 0x3b6   :  { %v241_v62 = vrot.slane %v240_v61, 4  ;;  %v224_v63 = vpop.permute.xlu0 %223 }
 0x3b7   :  { %v232_v1 = vrot.slane %v224_v63, %v152_v27  ;;  %v239_v2 = vmul.f32 %v224_v63, %v452_v9 }
 0x3b8   :  { %v242_v4 = vadd.f32 %v241_v62, %v240_v61 }
 0x3b9   :  { %v247_v5 = vsel %vm42_vm0, %v239_v2, 0.0  ;;  %v233_v6 = vsel %vm158_vm2, %v232_v1, %v228_v0 }
 0x3ba   :  { %v243_v7 = vrot.slane %v242_v4, 2  ;;  %v248_v8 = vrot.slane %v247_v5, 4  ;;  %235 = vst.msk [vmem:[#allocation5] sm:$0x3] %vm161_vm3, %v233_v6 }
 0x3bb   :  { %347 = shalt.err (!%p344_p4)
}
 0x3bc   :  { %279 = dma.vmem_to_hbm [thread:$0]  %s277_s4, 32, %s488_s6, [#allocation6]   ;;  %v244_v3 = vadd.f32 %v243_v7, %v242_v4  ;;  %v249_v9 = vadd.f32 %v248_v8, %v247_v5  ;;  %vm258_vm4 = vcmask 517120  }
 0x3bd   :  { %s382_s23 = smov [#allocation3]  }
 0x3be   :  { %v250_v10 = vrot.slane %v249_v9, 2  ;;  %v245_v12 = vrot.slane %v244_v3, 1  ;;  %s266_s24 = sshll.u32 %s382_s23, 4  ;;  %s267_s24 = int_to_ptr.vmem [resolvable:$true] %s266_s24 }
 0x3bf   :  { %s356_s25 = scalar_lea.vmem %s267_s24, 32  ;;  %p361_p6 = scmp.lt.s32.totalorder %s267_s24, %s267_s24 }
 0x3c0   :  { %v251_v11 = vadd.f32 %v250_v10, %v249_v9  ;;  %v246_v14 = vadd.f32 %v245_v12, %v244_v3  ;;  %p357_p5 = scmp.ne.s32.totalorder %s267_s24, %s356_s25  ;;  %p362_p7 = scmp.lt.s32.totalorder %s356_s25, %s356_s25 }
 0x3c2   :  { %v252_v13 = vrot.slane %v251_v11, 1  ;;  %p363_p8 = por %p362_p7, %p361_p6 }
 0x3c4   :  { %v253_v15 = vadd.f32 %v252_v13, %v251_v11  ;;  %p364_p9 = pnand %p363_p8, %p357_p5 }
 0x3c6   :  { %v256_v16 = vsel %vm158_vm2, %v253_v15, %v246_v14 }
 0x3c7   :  { %259 = vst.msk [vmem:[#allocation3] sm:$0x3] %vm258_vm4, %v256_v16 }
 0x3c8   :  { %367 = shalt.err (!%p364_p9)
}
 0x3c9   :  { %269 = dma.vmem_to_hbm [thread:$0]  %s267_s24, 32, %s487_s5, [#allocation4]  }
 0x3ca   :  { %376 = dma.done.wait [#allocation4], 32  }
 0x3cb   :  { %377 = vsyncadd [#allocation4], 4294967264 }
 0x3cc   :  { %378 = dma.done.wait [#allocation6], 32  }
 0x3cd   :  { %379 = vsyncadd [#allocation6], 4294967264 }
 0x3ce   :  { %286 = vsyncpa [#allocation4], 1 }
 0x3cf   :  { %287 = vsyncpa [#allocation6], 1 }

</bundles_post_ra>
